<compile_context>
chip_gen: v5e
topology: v5e:2x2
jax: 0.10.0
libtpu: 0.0.40
codegen_flags: <defaults>
</compile_context>

<pallas_src>
import jax
import jax.numpy as jnp
from jax import lax
from jax.experimental import pallas as pl
from jax.experimental.pallas import tpu as pltpu


def gait_mlp_kernel(x_ref,
                    w1_ref, b1_ref,
                    w2_ref, b2_ref,
                    w3_ref, b3_ref,
                    w4_ref, b4_ref,
                    o_ref):
    """One tile_b-row slab of the MLP, computed in (features, batch) layout."""
    mm_dtype = w1_ref.dtype                      # f32, or bf16 if enabled
    x = x_ref[...].astype(mm_dtype)              # (tile_b, F)

    # fc1: contract the F axis of both operands (q @ k^T pattern) so the
    # result comes out directly as (64, tile_b): lane-dense, MXU N fully
    # filled by the batch axis.  Accumulate in f32.
    h = lax.dot_general(w1_ref[...], x,
                        dimension_numbers=(((1,), (1,)), ((), ())),
                        preferred_element_type=jnp.float32)
    h = jnp.maximum(h + b1_ref[...], 0.0)        # (64, tile_b), f32

    # fc2 / fc3: plain (out, in) @ (in, tile_b) MXU matmuls.
    h = jnp.dot(w2_ref[...], h.astype(mm_dtype),
                preferred_element_type=jnp.float32)
    h = jnp.maximum(h + b2_ref[...], 0.0)        # (32, tile_b), f32

    h = jnp.dot(w3_ref[...], h.astype(mm_dtype),
                preferred_element_type=jnp.float32)
    h = jnp.maximum(h + b3_ref[...], 0.0)        # (16, tile_b), f32

    # fc4 (16 -> 1): VPU multiply + sublane reduction (XLU) instead of an
    # M=1 matmul; result is already the lane-dense (1, tile_b) output row.
    y = jnp.sum(h * w4_ref[...], axis=0, keepdims=True) + b4_ref[...]

    o_ref[...] = y.astype(o_ref.dtype)


def gait_anomaly_net(x, params, *, tile_b=2048, matmul_dtype=None):
    """Fused forward pass of GaitAnomalyNet.

    x:      [B, input_size] float32.
    params: dict name -> (w, b) in PyTorch nn.Linear layout
            (w: [out_features, in_features], b: [out_features]).
    Returns [B, 1] float32.

    tile_b: rows of x processed per grid step.  Must be a multiple of 128.
            Default 2048 is sized for v7x's 64 MiB VMEM; on v5e/v6e 4096-8192
            amortizes per-step overhead further.  On v7x keep
            cdiv(B, tile_b) >= 2 so both TensorCores get work.
    matmul_dtype: optional jnp.bfloat16 for the MXU operands (not bit-exact
            vs. the f32 reference); None keeps everything f32.
    """
    B, F = x.shape
    assert tile_b % 128 == 0, "tile_b must be a multiple of 128"

    w1, b1 = params["fc1"]
    w2, b2 = params["fc2"]
    w3, b3 = params["fc3"]
    w4, b4 = params["fc4"]

    # Biases as (out, 1) columns so they broadcast over the lane (batch) axis
    # of the transposed activations; fc4 weight as a (16, 1) column for the
    # in-kernel sublane reduction.  These stay f32 regardless of matmul_dtype.
    b1c = b1.reshape(-1, 1).astype(jnp.float32)
    b2c = b2.reshape(-1, 1).astype(jnp.float32)
    b3c = b3.reshape(-1, 1).astype(jnp.float32)
    b4c = b4.reshape(-1, 1).astype(jnp.float32)
    w4c = w4.reshape(-1, 1).astype(jnp.float32)   # (16, 1)

    if matmul_dtype is not None:
        w1 = w1.astype(matmul_dtype)
        w2 = w2.astype(matmul_dtype)
        w3 = w3.astype(matmul_dtype)

    num_blocks = pl.cdiv(B, tile_b)
    padded_b = num_blocks * tile_b   # only the (tiny) OUTPUT row is padded;
                                     # the input x is never copied/padded.

    def resident(arr):
        nd = arr.ndim
        return pl.BlockSpec(arr.shape, lambda i, _nd=nd: (0,) * _nd)

    out_row = pl.pallas_call(
        gait_mlp_kernel,
        out_shape=jax.ShapeDtypeStruct((1, padded_b), jnp.float32),
        grid=(num_blocks,),
        in_specs=[
            # x streamed in tile_b-row blocks; last block may be partial.
            pl.BlockSpec((tile_b, F), lambda i: (i, 0)),
            resident(w1), resident(b1c),
            resident(w2), resident(b2c),
            resident(w3), resident(b3c),
            resident(w4c), resident(b4c),
        ],
        # Lane-dense output: one (1, tile_b) row per grid step.
        out_specs=pl.BlockSpec((1, tile_b), lambda i: (0, i)),
        compiler_params=pltpu.CompilerParams(
            dimension_semantics=("parallel",),        # v7x: split over both TCs
            vmem_limit_bytes=48 * 1024 * 1024,        # above default scoped limit,
        ),                                            # below physical on all gens
    )(x, w1, b1c, w2, b2c, w3, b3c, w4c, b4c)

    # Drop padded tail columns (cheap: B*4 bytes), reshape to PyTorch's (B, 1).
    return out_row[0, :B].reshape(B, 1)


def init_params(key, input_size):
    """Deterministic init, PyTorch nn.Linear layout: w [out, in], b [out]."""
    sizes = [(input_size, 64), (64, 32), (32, 16), (16, 1)]
    names = ["fc1", "fc2", "fc3", "fc4"]
    params = {}
    for name, (fan_in, fan_out) in zip(names, sizes):
        key, kw, kb = jax.random.split(key, 3)
        bound = 1.0 / jnp.sqrt(float(fan_in))
        w = jax.random.uniform(kw, (fan_out, fan_in), jnp.float32, -bound, bound)
        b = jax.random.uniform(kb, (fan_out,), jnp.float32, -bound, bound)
        params[name] = (w, b)
    return params


def reference_forward(x, params):
    """Plain-JAX reference identical to the PyTorch forward."""
    h = x
    for name in ["fc1", "fc2", "fc3"]:
        w, b = params[name]
        h = jnp.maximum(h @ w.T + b, 0.0)
    w, b = params["fc4"]
    return h @ w.T + b


if __name__ == "__main__":
    key = jax.random.PRNGKey(0)
    k_params, k_x = jax.random.split(key)

    # Small test shapes.  batch is deliberately NOT a multiple of tile_b so the
    # partial boundary block (no jnp.pad path) is exercised, and tile_b gives
    # a multi-step "parallel" grid.
    batch = 200
    input_size = 32   # number of gait features
    tile_b = 128

    params = init_params(k_params, input_size)
    x = jax.random.normal(k_x, (batch, input_size), jnp.float32)

    ref = reference_forward(x, params)

    # Default f32 path (matches the PyTorch/f32 reference).
    out = gait_anomaly_net(x, params, tile_b=tile_b)
    out = jax.block_until_ready(out)
    assert out.shape == (batch, 1), out.shape
    assert jnp.allclose(out, ref, atol=1e-4, rtol=1e-4), "f32 kernel mismatch"

    # Optional bf16-operand path (reduced precision for the MXU only).
    out_bf16 = gait_anomaly_net(x, params, tile_b=tile_b,
                                matmul_dtype=jnp.bfloat16)
    out_bf16 = jax.block_until_ready(out_bf16)
    assert out_bf16.shape == (batch, 1), out_bf16.shape
    assert jnp.allclose(out_bf16, ref, atol=5e-2, rtol=5e-2), "bf16 kernel mismatch"

    print("KERNEL_OK")
</pallas_src>

<mosaic_0001>
module attributes {stable_mosaic.version = 11 : i64} {
  func.func @gait_mlp_kernel(%arg0: i32, %arg1: memref<128x32xf32, #tpu.memory_space<vmem>>, %arg2: memref<64x32xf32, #tpu.memory_space<vmem>>, %arg3: memref<64x1xf32, #tpu.memory_space<vmem>>, %arg4: memref<32x64xf32, #tpu.memory_space<vmem>>, %arg5: memref<32x1xf32, #tpu.memory_space<vmem>>, %arg6: memref<16x32xf32, #tpu.memory_space<vmem>>, %arg7: memref<16x1xf32, #tpu.memory_space<vmem>>, %arg8: memref<16x1xf32, #tpu.memory_space<vmem>>, %arg9: memref<1x1xf32, #tpu.memory_space<vmem>>, %arg10: memref<1x128xf32, #tpu.memory_space<vmem>>) attributes {dimension_semantics = [#tpu.dimension_semantics<parallel>], iteration_bounds = array<i64: 2>, scalar_prefetch = 0 : i64, scratch_operands = 0 : i64, tpu.core_type = #tpu.core_type<tc>, window_params = [{transform_indices = @transform_0, window_bounds = array<i64: 128, 32>}, {pipeline_mode = #tpu.pipeline_mode<synchronous>, transform_indices = @transform_1, window_bounds = array<i64: 64, 32>}, {pipeline_mode = #tpu.pipeline_mode<synchronous>, transform_indices = @transform_2, window_bounds = array<i64: 64, 1>}, {pipeline_mode = #tpu.pipeline_mode<synchronous>, transform_indices = @transform_3, window_bounds = array<i64: 32, 64>}, {pipeline_mode = #tpu.pipeline_mode<synchronous>, transform_indices = @transform_4, window_bounds = array<i64: 32, 1>}, {pipeline_mode = #tpu.pipeline_mode<synchronous>, transform_indices = @transform_5, window_bounds = array<i64: 16, 32>}, {pipeline_mode = #tpu.pipeline_mode<synchronous>, transform_indices = @transform_6, window_bounds = array<i64: 16, 1>}, {pipeline_mode = #tpu.pipeline_mode<synchronous>, transform_indices = @transform_7, window_bounds = array<i64: 16, 1>}, {pipeline_mode = #tpu.pipeline_mode<synchronous>, transform_indices = @transform_8, window_bounds = array<i64: 1, 1>}, {transform_indices = @transform_9, window_bounds = array<i64: 1, 128>}]} {
    %c0 = arith.constant 0 : index
    %c0_0 = arith.constant 0 : index
    %0 = vector.load %arg1[%c0, %c0_0] : memref<128x32xf32, #tpu.memory_space<vmem>>, vector<128x32xf32>
    %c0_1 = arith.constant 0 : index
    %c0_2 = arith.constant 0 : index
    %1 = vector.load %arg2[%c0_1, %c0_2] : memref<64x32xf32, #tpu.memory_space<vmem>>, vector<64x32xf32>
    %cst = arith.constant dense<0.000000e+00> : vector<64x128xf32>
    %2 = tpu.matmul %1, %0, %cst {dimension_numbers = #tpu.dot_dimension_numbers<[1], [1], [0], [0], [0, 0, 1, 0], [], []>} : vector<64x32xf32>, vector<128x32xf32>, vector<64x128xf32> -> vector<64x128xf32>
    %c0_3 = arith.constant 0 : index
    %c0_4 = arith.constant 0 : index
    %3 = vector.load %arg3[%c0_3, %c0_4] : memref<64x1xf32, #tpu.memory_space<vmem>>, vector<64x1xf32>
    %4 = vector.broadcast %3 : vector<64x1xf32> to vector<64x128xf32>
    %5 = arith.addf %2, %4 : vector<64x128xf32>
    %cst_5 = arith.constant 0.000000e+00 : f32
    %6 = vector.broadcast %cst_5 : f32 to vector<64x128xf32>
    %7 = arith.maximumf %5, %6 : vector<64x128xf32>
    %c0_6 = arith.constant 0 : index
    %c0_7 = arith.constant 0 : index
    %8 = vector.load %arg4[%c0_6, %c0_7] : memref<32x64xf32, #tpu.memory_space<vmem>>, vector<32x64xf32>
    %cst_8 = arith.constant dense<0.000000e+00> : vector<32x128xf32>
    %9 = tpu.matmul %8, %7, %cst_8 {dimension_numbers = #tpu.dot_dimension_numbers<[1], [0], [0], [1], [0, 0, 1, 1], [], []>} : vector<32x64xf32>, vector<64x128xf32>, vector<32x128xf32> -> vector<32x128xf32>
    %c0_9 = arith.constant 0 : index
    %c0_10 = arith.constant 0 : index
    %10 = vector.load %arg5[%c0_9, %c0_10] : memref<32x1xf32, #tpu.memory_space<vmem>>, vector<32x1xf32>
    %11 = vector.broadcast %10 : vector<32x1xf32> to vector<32x128xf32>
    %12 = arith.addf %9, %11 : vector<32x128xf32>
    %cst_11 = arith.constant 0.000000e+00 : f32
    %13 = vector.broadcast %cst_11 : f32 to vector<32x128xf32>
    %14 = arith.maximumf %12, %13 : vector<32x128xf32>
    %c0_12 = arith.constant 0 : index
    %c0_13 = arith.constant 0 : index
    %15 = vector.load %arg6[%c0_12, %c0_13] : memref<16x32xf32, #tpu.memory_space<vmem>>, vector<16x32xf32>
    %cst_14 = arith.constant dense<0.000000e+00> : vector<16x128xf32>
    %16 = tpu.matmul %15, %14, %cst_14 {dimension_numbers = #tpu.dot_dimension_numbers<[1], [0], [0], [1], [0, 0, 1, 1], [], []>} : vector<16x32xf32>, vector<32x128xf32>, vector<16x128xf32> -> vector<16x128xf32>
    %c0_15 = arith.constant 0 : index
    %c0_16 = arith.constant 0 : index
    %17 = vector.load %arg7[%c0_15, %c0_16] : memref<16x1xf32, #tpu.memory_space<vmem>>, vector<16x1xf32>
    %18 = vector.broadcast %17 : vector<16x1xf32> to vector<16x128xf32>
    %19 = arith.addf %16, %18 : vector<16x128xf32>
    %cst_17 = arith.constant 0.000000e+00 : f32
    %20 = vector.broadcast %cst_17 : f32 to vector<16x128xf32>
    %21 = arith.maximumf %19, %20 : vector<16x128xf32>
    %c0_18 = arith.constant 0 : index
    %c0_19 = arith.constant 0 : index
    %22 = vector.load %arg8[%c0_18, %c0_19] : memref<16x1xf32, #tpu.memory_space<vmem>>, vector<16x1xf32>
    %23 = vector.broadcast %22 : vector<16x1xf32> to vector<16x128xf32>
    %24 = arith.mulf %21, %23 : vector<16x128xf32>
    %cst_20 = arith.constant dense<0.000000e+00> : vector<128xf32>
    %25 = vector.multi_reduction <add>, %24, %cst_20 [0] : vector<16x128xf32> to vector<128xf32>
    %26 = vector.shape_cast %25 : vector<128xf32> to vector<1x128xf32>
    %c0_21 = arith.constant 0 : index
    %c0_22 = arith.constant 0 : index
    %27 = vector.load %arg9[%c0_21, %c0_22] : memref<1x1xf32, #tpu.memory_space<vmem>>, vector<1x1xf32>
    %28 = vector.broadcast %27 : vector<1x1xf32> to vector<1x128xf32>
    %29 = arith.addf %26, %28 : vector<1x128xf32>
    %c0_23 = arith.constant 0 : index
    %c0_24 = arith.constant 0 : index
    %30 = vector.load %arg10[%c0_23, %c0_24] : memref<1x128xf32, #tpu.memory_space<vmem>>, vector<1x128xf32>
    tpu.vector_store %arg10[%c0_23, %c0_24], %29 {strides = array<i32>} : memref<1x128xf32, #tpu.memory_space<vmem>>, vector<1x128xf32>,
    return
  }
  func.func @transform_0(%arg0: i32) -> (i32, i32) {
    %c0_i32 = arith.constant 0 : i32
    %c0_i32_0 = arith.constant 0 : i32
    return %arg0, %c0_i32 : i32, i32
  }
  func.func @transform_1(%arg0: i32) -> (i32, i32) {
    %c0_i32 = arith.constant 0 : i32
    %c0_i32_0 = arith.constant 0 : i32
    %c0_i32_1 = arith.constant 0 : i32
    return %c0_i32, %c0_i32_0 : i32, i32
  }
  func.func @transform_2(%arg0: i32) -> (i32, i32) {
    %c0_i32 = arith.constant 0 : i32
    %c0_i32_0 = arith.constant 0 : i32
    %c0_i32_1 = arith.constant 0 : i32
    return %c0_i32, %c0_i32_0 : i32, i32
  }
  func.func @transform_3(%arg0: i32) -> (i32, i32) {
    %c0_i32 = arith.constant 0 : i32
    %c0_i32_0 = arith.constant 0 : i32
    %c0_i32_1 = arith.constant 0 : i32
    return %c0_i32, %c0_i32_0 : i32, i32
  }
  func.func @transform_4(%arg0: i32) -> (i32, i32) {
    %c0_i32 = arith.constant 0 : i32
    %c0_i32_0 = arith.constant 0 : i32
    %c0_i32_1 = arith.constant 0 : i32
    return %c0_i32, %c0_i32_0 : i32, i32
  }
  func.func @transform_5(%arg0: i32) -> (i32, i32) {
    %c0_i32 = arith.constant 0 : i32
    %c0_i32_0 = arith.constant 0 : i32
    %c0_i32_1 = arith.constant 0 : i32
    return %c0_i32, %c0_i32_0 : i32, i32
  }
  func.func @transform_6(%arg0: i32) -> (i32, i32) {
    %c0_i32 = arith.constant 0 : i32
    %c0_i32_0 = arith.constant 0 : i32
    %c0_i32_1 = arith.constant 0 : i32
    return %c0_i32, %c0_i32_0 : i32, i32
  }
  func.func @transform_7(%arg0: i32) -> (i32, i32) {
    %c0_i32 = arith.constant 0 : i32
    %c0_i32_0 = arith.constant 0 : i32
    %c0_i32_1 = arith.constant 0 : i32
    return %c0_i32, %c0_i32_0 : i32, i32
  }
  func.func @transform_8(%arg0: i32) -> (i32, i32) {
    %c0_i32 = arith.constant 0 : i32
    %c0_i32_0 = arith.constant 0 : i32
    %c0_i32_1 = arith.constant 0 : i32
    return %c0_i32, %c0_i32_0 : i32, i32
  }
  func.func @transform_9(%arg0: i32) -> (i32, i32) {
    %c0_i32 = arith.constant 0 : i32
    %c0_i32_0 = arith.constant 0 : i32
    return %c0_i32, %arg0 : i32, i32
  }
}

</mosaic_0001>

<bundles_post_ra>
// kernel: tpu_custom_call.1
= control target key start
LH: loop header
LB: loop body
LE: loop exit
PB: predicated region body
PF: predicated region fallthrough
CT: control target
= control target key end

     0   :  { %s1214_s0 = inlined_call_operand.vmem [shape: f32[200,32], index: 0, kind: input, shape index: {}]   ;;  %s1215_s1 = inlined_call_operand.vmem [shape: f32[64,32], index: 1, kind: input, shape index: {}]   ;;  %s1216_s2 = inlined_call_operand.vmem [shape: f32[64,1], index: 2, kind: input, shape index: {}]   ;;  %s1217_s3 = inlined_call_operand.vmem [shape: f32[32,64], index: 3, kind: input, shape index: {}]   ;;  %s1218_s4 = inlined_call_operand.vmem [shape: f32[32,1], index: 4, kind: input, shape index: {}]   ;;  %s1219_s5 = inlined_call_operand.vmem [shape: f32[16,32], index: 5, kind: input, shape index: {}]   ;;  %s1220_s6 = inlined_call_operand.vmem [shape: f32[16,1], index: 6, kind: input, shape index: {}]   ;;  %s1221_s7 = inlined_call_operand.vmem [shape: f32[16,1], index: 7, kind: input, shape index: {}]   ;;  %s1222_s8 = inlined_call_operand.<no memory space> [shape: f32[1,1], index: 8, kind: input, shape index: {}]   ;;  %s1223_s9 = inlined_call_operand.hbm [shape: f32[1,256], index: 9, kind: output, shape index: {}]  }
   0x1   :  { %v14_v0 = vstv %s1222_s8 }
   0x2   :  { %15 = vst [vmem:[#allocation2] sm:$0x1] %v14_v0 }
   0x3   :  { %16 = vsyncpa [#allocation4], 0 }
   0x4   :  { %18 = vsyncpa [#allocation4 + $0x1], 0  ;;  %s980_s11 = smov 0   ;;  %s982_s12 = smov 0  }
   0x5   :  { %s984_s13 = smov 0   ;;  %s986_s14 = smov 0  }
   0x6 LB: > { %s1001_s8 = sadd.s32 4294967295, %s924_s14   ;;  %s765_s15 = sadd.s32 4294967294, %s924_s14   ;;  %s924_s14 = sphi %s986_s14, %s1229_s14   ;;  %s920_s13 = sphi %s984_s13, %s1228_s13   ;;  %s916_s12 = sphi %s982_s12, %s1227_s12   ;;  %s912_s11 = sphi %s980_s11, %s1226_s11  }
   0x7   : > { %s1005_s16 = sadd.s32 1, %s924_s14   ;;  %s225_s17 = sadd.s32 1, %s920_s13 }
   0x8   : > { %s222_s18 = ssub.s32 %s924_s14, %s1005_s16  ;;  %p235_p0 = scmp.ne.s32.totalorder %s920_s13, %s916_s12 }
   0x9   : > { %p223_p1 = scmp.eq.s32.totalorder %s222_s18, 0  ;;  %p236_p2 = scmp.eq.s32.totalorder %s1001_s8, 1 }
   0xa   : > { %p241_p3 = scmp.ne.s32.totalorder %s916_s12, %s912_s11  ;;  %p242_p4 = scmp.eq.s32.totalorder %s765_s15, 1 }
   0xb   : > { %s1016_s19 = scalar_select %p223_p1, %s920_s13, %s225_s17  }
   0xc   : > { %p1018_p5 = por %p236_p2, %p235_p0  ;;  %p1022_p6 = por %p242_p4, %p241_p3 }
   0xd   : > { %p768_p7 = scmp.ge.s32.totalorder %s924_s14, 1  ;;  %p301_p8 = scmp.lt.s32.totalorder %s924_s14, 3 }
   0xf   : > { %p302_p9 = pnand %p768_p7, %p301_p8 }
  0x10   : > { %s769_s22 = sshll.u32 (!%p302_p9), %s1001_s8, 4  ;;  %s706_s25 = scalar_lea.hbm (!%p302_p9), %s1223_s9, %s1001_s8 }
  0x11   : > { %305 = sbr.rel (%p302_p9) target bundleno = 614 (0x266), region = 56  ;;  %p345_p10 = scmp.lt.s32.totalorder (!%p302_p9), %s769_s22, 24 }
  0x12   : > { %s710_s29 = sshll.u32 (!%p302_p9), %s706_s25, 4  ;;  %s882_s17 = scalar_lea.hbm (!%p302_p9), %s1223_s9, 2  ;;  %s711_s29 = int_to_ptr.hbm [resolvable:$true] %s710_s29 }
  0x13   : > { %s876_s30 = sshra.s32 (!%p302_p9), %s711_s29, 4  ;;  %s877_s30 = int_to_ptr.hbm [resolvable:$true] %s876_s30 }
  0x14   : > { %s878_s10 = scalar_lea.hbm (!%p302_p9), %s877_s30, 1  ;;  %p883_p0 = scmp.lt.s32.totalorder (!%p302_p9), %s877_s30, %s1223_s9 }
  0x15   : > { %p879_p11 = scmp.ne.s32.totalorder (!%p302_p9), %s877_s30, %s878_s10  ;;  %p884_p1 = scmp.lt.s32.totalorder (!%p302_p9), %s882_s17, %s878_s10 }
  0x16   : > { %s1231_s22 = smov (!%p345_p10, %s769_s22), 24  ;;  %vm426_vm0 = vcmask 261120   ;;  %v926_v10 = vmov 0   ;;  %v385_v11 = vld [vmem:[%s1216_s2 + $0x38] sm:$0xff]  ;;  %v384_v14 = vld [vmem:[%s1216_s2 + $0x30] sm:$0xff]  ;;  %v379_v17 = vld [vmem:[%s1216_s2 + $0x8] sm:$0xff] }
  0x17   : > { %s770_s23 = sshll.u32 %s1231_s22, 3  ;;  %859 = vset.pattern.permute.xlu0 %v926_v10  ;;  %860 = vset.pattern.permute.xlu1 %v926_v10  ;;  %v383_v18 = vld [vmem:[%s1216_s2 + $0x28] sm:$0xff]  ;;  %v382_v21 = vld [vmem:[%s1216_s2 + $0x20] sm:$0xff]  ;;  %v372_v25 = vld [vmem:[%s1215_s1 + $0x10] sm:$0xff]  ;;  %vm576_vm1 = vcmask 523264   ;;  %s338_s22 = sand.u32 1, %s916_s12  }
  0x18   : > { %s1032_s26 = scalar_lea.vmem %s1214_s0, %s770_s23  ;;  %861 = vset.pattern.permute.xlu2 %v926_v10  ;;  %423 = vperm.xlu0 %859, %v385_v11   ;;  %v371_v23 = vld [vmem:[%s1215_s1 + $0x8] sm:$0xff]  ;;  %v378_v24 = vld [vmem:[%s1216_s2] sm:$0xff]  ;;  %v381_v26 = vld [vmem:[%s1216_s2 + $0x18] sm:$0xff]  ;;  %s339_s27 = scalar_lea.vmem [#allocation3], %s338_s22 }
  0x19   : > { %v369_v1 = vld [vmem:[%s1032_s26 + $0x78] sm:$0xff]  ;;  %v368_v2 = vld [vmem:[%s1032_s26 + $0x70] sm:$0xff]  ;;  %v367_v3 = vld [vmem:[%s1032_s26 + $0x68] sm:$0xff]  ;;  %413 = vperm.xlu1 %860, %v383_v18   ;;  %403 = vperm.xlu2 %861, %v381_v26   ;;  %s708_s28 = sshll.u32 %s339_s27, 4  ;;  %p880_p12 = pnand %p879_p11, %p1018_p5  ;;  %s709_s28 = int_to_ptr.vmem [resolvable:$true] %s708_s28 }
  0x1a   : > { %803 = vmatpush.xpose.msk.msra.mxu3 %vm426_vm0, %v369_v1  ;;  %771 = vmatpush.xpose.msk.msra.mxu0 %vm426_vm0, %v369_v1  ;;  %v366_v4 = vld [vmem:[%s1032_s26 + $0x60] sm:$0xff]  ;;  %v365_v5 = vld [vmem:[%s1032_s26 + $0x58] sm:$0xff]  ;;  %v364_v6 = vld [vmem:[%s1032_s26 + $0x50] sm:$0xff]  ;;  %p885_p2 = por %p884_p1, %p883_p0 }
  0x1b   : > { %v363_v7 = vld [vmem:[%s1032_s26 + $0x48] sm:$0xff]  ;;  %v362_v8 = vld [vmem:[%s1032_s26 + $0x40] sm:$0xff]  ;;  %v361_v9 = vld [vmem:[%s1032_s26 + $0x38] sm:$0xff]  ;;  %p881_p13 = pneg %p880_p12 }
  0x1c   : > { %v360_v12 = vld [vmem:[%s1032_s26 + $0x30] sm:$0xff]  ;;  %v359_v13 = vld [vmem:[%s1032_s26 + $0x28] sm:$0xff]  ;;  %v358_v15 = vld [vmem:[%s1032_s26 + $0x20] sm:$0xff] }
  0x1d   : > { %v357_v16 = vld [vmem:[%s1032_s26 + $0x18] sm:$0xff]  ;;  %v356_v19 = vld [vmem:[%s1032_s26 + $0x10] sm:$0xff]  ;;  %v355_v20 = vld [vmem:[%s1032_s26 + $0x8] sm:$0xff]  ;;  %p886_p3 = pnand %p885_p2, %p881_p13 }
  0x1e   : > { %804 = vmatpush.xpose.msk.msra.mxu3 %vm426_vm0, %v368_v2  ;;  %772 = vmatpush.xpose.msk.msra.mxu0 %vm426_vm0, %v368_v2  ;;  %v354_v22 = vld [vmem:[%s1032_s26] sm:$0xff]  ;;  %v554_v27 = vld [vmem:[%s1218_s4 + $0x10] sm:$0xff]  ;;  %v553_v28 = vld [vmem:[%s1218_s4 + $0x8] sm:$0xff]  ;;  %s698_s26 = scalar_lea.sflag [#allocation4], %s338_s22 }
  0x1f   : > { %v373_v29 = vld [vmem:[%s1215_s1 + $0x18] sm:$0xff]  ;;  %v380_v30 = vld [vmem:[%s1216_s2 + $0x10] sm:$0xff]  ;;  %v624_v31 = vld [vmem:[%s1220_s6] sm:$0xff] }
  0x20   : > { %418 = vperm.xlu0 %859, %v384_v14   ;;  %v370_v32 = vld [vmem:[%s1215_s1] sm:$0xff]  ;;  %v625_v33 = vld [vmem:[%s1220_s6 + $0x8] sm:$0xff]  ;;  %v555_v36 = vld [vmem:[%s1218_s4 + $0x18] sm:$0xff] }
  0x21   : > { %408 = vperm.xlu1 %860, %v382_v21   ;;  %398 = vperm.xlu2 %861, %v380_v30   ;;  %v374_v34 = vld [vmem:[%s1215_s1 + $0x20] sm:$0xff]  ;;  %v668_v35 = vld [vmem:[%s1221_s7 + $0x8] sm:$0xff]  ;;  %v376_v40 = vld [vmem:[%s1215_s1 + $0x30] sm:$0xff] }
  0x22   : > { %805 = vmatpush.xpose.msk.msra.mxu3 %vm426_vm0, %v367_v3  ;;  %773 = vmatpush.xpose.msk.msra.mxu0 %vm426_vm0, %v367_v3  ;;  %v688_v37 = vld [vmem:[#allocation2] sm:$0x1]  ;;  %v375_v38 = vld [vmem:[%s1215_s1 + $0x28] sm:$0xff]  ;;  %v377_v42 = vld [vmem:[%s1215_s1 + $0x38] sm:$0xff] }
  0x23   : > { %v552_v39 = vld [vmem:[%s1218_s4] sm:$0xff]  ;;  %v551_v14 = vld [vmem:[%s1217_s3 + $0x18] sm:$0xff] }
  0x24   : > { %v667_v41 = vld [vmem:[%s1221_s7] sm:$0xff] }
  0x25   : > { %v548_v11 = vld [vmem:[%s1217_s3] sm:$0xff] }
  0x26   : > { %806 = vmatpush.xpose.msk.msra.mxu3 %vm426_vm0, %v366_v4  ;;  %774 = vmatpush.xpose.msk.msra.mxu0 %vm426_vm0, %v366_v4 }
  0x28   : > { %393 = vperm.xlu0 %859, %v379_v17  }
  0x29   : > { %388 = vperm.xlu1 %860, %v378_v24   ;;  %573 = vperm.xlu2 %861, %v555_v36  }
  0x2a   : > { %807 = vmatpush.xpose.msk.msra.mxu3 %vm426_vm0, %v365_v5  ;;  %775 = vmatpush.xpose.msk.msra.mxu0 %vm426_vm0, %v365_v5 }
  0x2e   : > { %808 = vmatpush.xpose.msk.msra.mxu3 %vm426_vm0, %v364_v6  ;;  %776 = vmatpush.xpose.msk.msra.mxu0 %vm426_vm0, %v364_v6 }
  0x30   : > { %568 = vperm.xlu0 %859, %v554_v27  }
  0x31   : > { %563 = vperm.xlu1 %860, %v553_v28   ;;  %558 = vperm.xlu2 %861, %v552_v39  }
  0x32   : > { %809 = vmatpush.xpose.msk.msra.mxu3 %vm426_vm0, %v363_v7  ;;  %777 = vmatpush.xpose.msk.msra.mxu0 %vm426_vm0, %v363_v7 }
  0x36   : > { %810 = vmatpush.xpose.msk.msra.mxu3 %vm426_vm0, %v362_v8  ;;  %778 = vmatpush.xpose.msk.msra.mxu0 %vm426_vm0, %v362_v8 }
  0x38   : > { %628 = vperm.xlu0 %859, %v624_v31   ;;  %v622_v31 = vld [vmem:[%s1219_s5] sm:$0xff] }
  0x39   : > { %633 = vperm.xlu1 %860, %v625_v33   ;;  %671 = vperm.xlu2 %861, %v667_v41  }
  0x3a   : > { %811 = vmatpush.xpose.msk.msra.mxu3 %vm426_vm0, %v361_v9  ;;  %779 = vmatpush.xpose.msk.msra.mxu0 %vm426_vm0, %v361_v9 }
  0x3e   : > { %812 = vmatpush.xpose.msk.msra.mxu3 %vm426_vm0, %v360_v12  ;;  %780 = vmatpush.xpose.msk.msra.mxu0 %vm426_vm0, %v360_v12  ;;  %v549_v12 = vld [vmem:[%s1217_s3 + $0x8] sm:$0xff] }
  0x40   : > { %676 = vperm.xlu0 %859, %v668_v35  }
  0x41   : > { %691 = vperm.xlu1 %860, %v688_v37  }
  0x42   : > { %813 = vmatpush.xpose.msk.msra.mxu3 %vm426_vm0, %v359_v13  ;;  %781 = vmatpush.xpose.msk.msra.mxu0 %vm426_vm0, %v359_v13  ;;  %v550_v13 = vld [vmem:[%s1217_s3 + $0x10] sm:$0xff] }
  0x46   : > { %814 = vmatpush.xpose.msk.msra.mxu3 %vm426_vm0, %v358_v15  ;;  %782 = vmatpush.xpose.msk.msra.mxu0 %vm426_vm0, %v358_v15 }
  0x4a   : > { %815 = vmatpush.xpose.msk.msra.mxu3 %vm426_vm0, %v357_v16  ;;  %783 = vmatpush.xpose.msk.msra.mxu0 %vm426_vm0, %v357_v16 }
  0x4e   : > { %816 = vmatpush.xpose.msk.msra.mxu3 %vm426_vm0, %v356_v19  ;;  %784 = vmatpush.xpose.msk.msra.mxu0 %vm426_vm0, %v356_v19 }
  0x52   : > { %817 = vmatpush.xpose.msk.msra.mxu3 %vm426_vm0, %v355_v20  ;;  %785 = vmatpush.xpose.msk.msra.mxu0 %vm426_vm0, %v355_v20 }
  0x56   : > { %818 = vmatpush.xpose.msk.msra.mxu3 %vm426_vm0, %v354_v22  ;;  %786 = vmatpush.xpose.msk.msra.mxu0 %vm426_vm0, %v354_v22 }
  0x59   : > { %788 = vmatmul.msk.f32.vlgmr.msra.gmra.mxu3 %vm426_vm0, %v371_v23  ;;  %787 = vmatmul.msk.f32.vlgmr.msra.gmra.mxu0 %vm426_vm0, %v370_v32  ;;  %v623_v32 = vld [vmem:[%s1219_s5 + $0x8] sm:$0xff] }
  0x61   : > { %789 = vmatmul.msk.f32.gmra.mxu3 %vm426_vm0, %v372_v25 }
  0x69   : > { %790 = vmatmul.msk.f32.gmra.mxu3 %vm426_vm0, %v373_v29 }
  0x71   : > { %791 = vmatmul.msk.f32.gmra.mxu3 %vm426_vm0, %v374_v34 }
  0x73   : > { %v404_v51 = vpop.permute.xlu2 %403 }
  0x79   : > { %792 = vmatmul.msk.f32.gmra.mxu3 %vm426_vm0, %v375_v38 }
  0x7b   : > { %v399_v61 = vpop.permute.xlu2 %398 }
  0x81   : > { %793 = vmatmul.msk.f32.gmra.mxu3 %vm426_vm0, %v376_v40 }
  0x83   : > { %v574_v18 = vpop.permute.xlu2 %573 }
  0x89   : > { %794 = vmatmul.msk.f32.gmra.mxu3 %vm426_vm0, %v377_v42 }
  0x8a   : > { %v424_v48 = vpop.permute.xlu0 %423 }
  0x8b   : > { %v414_v49 = vpop.permute.xlu1 %413  ;;  %v559_v26 = vpop.permute.xlu2 %558 }
  0x92   : > { %v419_v52 = vpop.permute.xlu0 %418 }
  0x93   : > { %v409_v56 = vpop.permute.xlu1 %408  ;;  %v672_v42 = vpop.permute.xlu2 %671 }
  0x9a   : > { %v394_v0 = vpop.permute.xlu0 %393 }
  0x9b   : > { %v389_v6 = vpop.permute.xlu1 %388 }
  0xa2   : > { %v569_v19 = vpop.permute.xlu0 %568 }
  0xa3   : > { %v564_v23 = vpop.permute.xlu1 %563 }
  0xaa   : > { %v629_v34 = vpop.permute.xlu0 %628 }
  0xab   : > { %v634_v36 = vpop.permute.xlu1 %633 }
  0xb2   : > { %v677_v41 = vpop.permute.xlu0 %676 }
  0xd6   : > { %v516_v3 = vpop.f32.mrf.mxu0 }
  0xd7   : > { %v517_v8 = vadd.f32 %v516_v3, %v389_v6 }
  0xd9   : > { %v540_v10 = vmax.f32 %v517_v8, 0.0 }
  0xdc   : > { %v519_v43 = vpop.f32.mrf.mxu3 }
  0xdd   : > { %v520_v4 = vadd.f32 %v519_v43, %v394_v0 }
  0xdf   : > { %v541_v9 = vmax.f32 %v520_v4, 0.0 }
  0xe4   : > { %v522_v44 = vpop.f32.mrf.mxu3 }
  0xe5   : > { %v523_v1 = vadd.f32 %v522_v44, %v399_v61 }
  0xe7   : > { %v542_v7 = vmax.f32 %v523_v1, 0.0 }
  0xec   : > { %v525_v45 = vpop.f32.mrf.mxu3 }
  0xed   : > { %v526_v62 = vadd.f32 %v525_v45, %v404_v51 }
  0xef   : > { %v543_v5 = vmax.f32 %v526_v62, 0.0 }
  0xf4   : > { %v528_v46 = vpop.f32.mrf.mxu3 }
  0xf5   : > { %v529_v59 = vadd.f32 %v528_v46, %v409_v56 }
  0xf7   : > { %v544_v2 = vmax.f32 %v529_v59, 0.0 }
  0xfc   : > { %v531_v47 = vpop.f32.mrf.mxu3 }
  0xfd   : > { %v532_v57 = vadd.f32 %v531_v47, %v414_v49 }
  0xff   : > { %v545_v63 = vmax.f32 %v532_v57, 0.0 }
 0x104   : > { %v534_v50 = vpop.f32.mrf.mxu3 }
 0x105   : > { %v535_v54 = vadd.f32 %v534_v50, %v419_v52  ;;  %v692_v50 = vpop.permute.xlu1 %691 }
 0x106   : > { %v694_v52 = vperm.slane %v692_v50, 0 }
 0x107   : > { %v546_v60 = vmax.f32 %v535_v54, 0.0 }
 0x10c   : > { %v537_v53 = vpop.f32.mrf.mxu3 }
 0x10d   : > { %v538_v55 = vadd.f32 %v537_v53, %v424_v48 }
 0x10f   : > { %v547_v58 = vmax.f32 %v538_v55, 0.0 }
 0x111   : > { %597 = vmatpush.msra.mxu1 %v547_v58 }
 0x113   : > { %598 = vmatpush.msra.mxu1 %v546_v60 }
 0x115   : > { %599 = vmatpush.msra.mxu1 %v545_v63 }
 0x117   : > { %600 = vmatpush.msra.mxu1 %v544_v2 }
 0x119   : > { %601 = vmatpush.msra.mxu1 %v543_v5 }
 0x11b   : > { %602 = vmatpush.msra.mxu1 %v542_v7 }
 0x11d   : > { %603 = vmatpush.msra.mxu1 %v541_v9 }
 0x11f   : > { %604 = vmatpush.msra.mxu1 %v540_v10 }
 0x120   : > { %795 = vmatmul.msk.f32.vlgmr.msra.gmra.mxu1 %vm576_vm1, %v548_v11 }
 0x128   : > { %796 = vmatmul.msk.f32.gmra.mxu1 %vm576_vm1, %v549_v12 }
 0x130   : > { %797 = vmatmul.msk.f32.gmra.mxu1 %vm576_vm1, %v550_v13 }
 0x138   : > { %798 = vmatmul.msk.f32.gmra.mxu1 %vm576_vm1, %v551_v14 }
 0x19d   : > { %v606_v15 = vpop.f32.mrf.mxu1 }
 0x19e   : > { %v607_v27 = vadd.f32 %v606_v15, %v559_v26 }
 0x1a0   : > { %v618_v30 = vmax.f32 %v607_v27, 0.0 }
 0x1a5   : > { %v609_v16 = vpop.f32.mrf.mxu1 }
 0x1a6   : > { %v610_v24 = vadd.f32 %v609_v16, %v564_v23 }
 0x1a8   : > { %v619_v29 = vmax.f32 %v610_v24, 0.0 }
 0x1ad   : > { %v612_v17 = vpop.f32.mrf.mxu1 }
 0x1ae   : > { %v613_v21 = vadd.f32 %v612_v17, %v569_v19 }
 0x1b0   : > { %v620_v28 = vmax.f32 %v613_v21, 0.0 }
 0x1b5   : > { %v615_v20 = vpop.f32.mrf.mxu1 }
 0x1b6   : > { %v616_v22 = vadd.f32 %v615_v20, %v574_v18 }
 0x1b8   : > { %v621_v25 = vmax.f32 %v616_v22, 0.0 }
 0x1ba   : > { %654 = vmatpush.msra.mxu2 %v621_v25 }
 0x1bc   : > { %655 = vmatpush.msra.mxu2 %v620_v28 }
 0x1be   : > { %656 = vmatpush.msra.mxu2 %v619_v29 }
 0x1c0   : > { %657 = vmatpush.msra.mxu2 %v618_v30 }
 0x1c1   : > { %799 = vmatmul.msk.f32.vlgmr.msra.gmra.mxu2 %vm426_vm0, %v622_v31 }
 0x1c9   : > { %800 = vmatmul.msk.f32.gmra.mxu2 %vm426_vm0, %v623_v32 }
 0x244   : > { %v659_v33 = vpop.f32.mrf.mxu2 }
 0x245   : > { %v660_v35 = vadd.f32 %v659_v33, %v629_v34 }
 0x247   : > { %v665_v38 = vmax.f32 %v660_v35, 0.0 }
 0x249   : > { %v679_v43 = vmul.f32 %v672_v42, %v665_v38 }
 0x24c   : > { %v662_v37 = vpop.f32.mrf.mxu2 }
 0x24d   : > { %v663_v39 = vadd.f32 %v662_v37, %v634_v36 }
 0x24f   : > { %v666_v40 = vmax.f32 %v663_v39, 0.0 }
 0x251   : > { %v680_v44 = vmul.f32 %v677_v41, %v666_v40 }
 0x253   : > { %v681_v45 = vadd.f32 %v680_v44, %v679_v43 }
 0x255   : > { %v682_v46 = vrot.slane %v681_v45, 4 }
 0x257   : > { %v683_v47 = vadd.f32 %v682_v46, %v681_v45 }
 0x259   : > { %v684_v48 = vrot.slane %v683_v47, 2 }
 0x25b   : > { %v685_v49 = vadd.f32 %v684_v48, %v683_v47 }
 0x25d   : > { %v686_v51 = vrot.slane %v685_v49, 1 }
 0x25f   : > { %v687_v53 = vadd.f32 %v686_v51, %v685_v49 }
 0x261   : > { %v695_v54 = vadd.f32 %v694_v52, %v687_v53 }
 0x263   : > { %696 = vst [vmem:[%s339_s27] sm:$0x1] %v695_v54 }
 0x264   : > { %889 = shalt.err (!%p886_p3)
}
 0x265   : > { %819 = dma.vmem_to_hbm [thread:$0]  (%p1018_p5), %s709_s28, 16, %s711_s29, %s698_s26  }
 0x266 PF: > { %p825_p4 = scmp.ge.s32.totalorder %s924_s14, 2  ;;  %s722_s22 = sand.u32 1, %s912_s11  }
 0x267   : > { %s723_s24 = scalar_lea.sflag [#allocation4], %s722_s22 }
 0x268   : > { %p822_p7 = pnand %p825_p4, %p1022_p6 }
 0x26a   : > { %p823_p8 = pneg %p822_p7 }
 0x26c   : > { %907 = dma.done.wait (%p823_p8), %s723_s24, 16  }
 0x26d   : > { %909 = vsyncadd (%p823_p8), %s723_s24, 4294967280  ;;  %p21_p9 = scmp.ge.s32.totalorder %s1005_s16, 4   ;;  %s1226_s11 = smov %s916_s12 }
 0x26e   : > { %s1227_s12 = smov %s920_s13  ;;  %s1228_s13 = smov %s1016_s19 }
 0x26f   : > { %s1229_s14 = smov %s1005_s16  ;;  %23 = sbr.rel (!%p21_p9) target bundleno = 6 (0x6), region = 91 }
 0x274   :  { %728 = vsyncpa [#allocation4], 1 }
 0x275   :  { %730 = vsyncpa [#allocation4 + $0x1], 1 }

</bundles_post_ra>
